<compile_context>
chip_gen: v7x
topology: tpu7x:2x2x1
jax: 0.10.0
libtpu: 0.0.40
codegen_flags: <defaults>
</compile_context>

<pallas_src>
import functools

import jax
import jax.numpy as jnp
from jax.experimental import pallas as pl
from jax.experimental.pallas import tpu as pltpu

LANE = 128
SUBLANE = 8


def _round_up(n, m):
    return ((n + m - 1) // m) * m


def _pad2d(a, rows, cols):
    return jnp.pad(a, ((0, rows - a.shape[0]), (0, cols - a.shape[1])))


def _sigmoid(x):
    # One EUP op (tanh) instead of exp + divide.
    return 0.5 * (jnp.tanh(0.5 * x) + 1.0)


def autoencoder_kernel(x_ref, w_enc_ref, w_dec_ref, hw_t_ref,
                       b1_ref, b2_ref, hb_ref, o_ref, *, mxu_dtype):
    x = x_ref[...]                                            # (bt, D_in) f32

    # encode: relu(X @ W.T + b1)   (W.T pre-transposed + lane-padded in wrapper)
    enc = jnp.dot(x.astype(mxu_dtype), w_enc_ref[...],
                  preferred_element_type=jnp.float32)
    enc = jnp.maximum(enc + b1_ref[...], 0.0)                 # (bt, D_out_p)

    # highway block H(100): t = sigmoid(h); x = relu(h)*t + x*(1-t)
    h = jnp.dot(enc.astype(mxu_dtype), hw_t_ref[...],
                preferred_element_type=jnp.float32)
    h = h + hb_ref[...]
    t = _sigmoid(h)
    hwy = enc + t * (jnp.maximum(h, 0.0) - enc)               # == relu(h)*t + enc*(1-t)

    # decode: sigmoid(X @ W + b2)
    dec = jnp.dot(hwy.astype(mxu_dtype), w_dec_ref[...],
                  preferred_element_type=jnp.float32)
    o_ref[...] = _sigmoid(dec + b2_ref[...])                  # (bt, D_in)


def auto_encodeur_forward(x, w, b1, b2, hw, hb, *,
                          b_tile=2048, mxu_dtype=jnp.bfloat16):
    B, D_in = x.shape
    D_out = w.shape[0]
    assert D_out == 100, "highway block inside forward is hard-coded to size 100"

    D_out_p = _round_up(D_out, LANE)          # 100 -> 128 (weights only)

    # ---- one-time weight prep (tiny, ~0.2 MiB): lane-pad + pre-transpose ----
    w_f32 = w.astype(jnp.float32)
    w_pad = _pad2d(w_f32, D_out_p, D_in)                     # (D_out_p, D_in)
    w_enc = w_pad.T.astype(mxu_dtype)                        # encode:  X @ W.T
    w_dec = w_pad.astype(mxu_dtype)                          # decode:  X @ W
    hw_t = _pad2d(hw.astype(jnp.float32), D_out_p, D_out_p).T.astype(mxu_dtype)
    b1_p = _pad2d(b1.reshape(1, D_out).astype(jnp.float32), 1, D_out_p)
    hb_p = _pad2d(hb.reshape(1, D_out).astype(jnp.float32), 1, D_out_p)
    b2_p = b2.reshape(1, D_in).astype(jnp.float32)

    x_f32 = x.astype(jnp.float32)                            # no feature/batch padding

    # ---- batch tile: multiple of 8, >=2 grid steps when B allows (v7x megacore) ----
    bt = max(SUBLANE, min(int(b_tile), _round_up(pl.cdiv(B, 2), SUBLANE)))
    grid = (pl.cdiv(B, bt),)                                 # ragged last block is masked

    # ---- VMEM budget: double-buffered x/out tiles + weights + in-kernel temps ----
    w_item = jnp.dtype(mxu_dtype).itemsize
    io_bytes = 2 * 2 * bt * D_in * 4                          # x + out, double-buffered
    weight_bytes = 2 * w_item * (2 * D_in * D_out_p + D_out_p * D_out_p)
    interm_bytes = 8 * bt * D_out_p * 4                       # generous body temporaries
    vmem_limit = int(min(48 << 20,                            # cap: v7x has 64 MiB physical
                         max(24 << 20,
                             io_bytes + weight_bytes + interm_bytes + (8 << 20))))

    flops = 2 * B * (D_in * D_out_p + D_out_p * D_out_p + D_out_p * D_in)
    transcendentals = B * (D_out_p + D_in)                    # two tanh-based sigmoids
    bytes_accessed = 4 * (2 * B * D_in + 2 * D_out_p + D_in) \
        + w_item * (2 * D_out_p * D_in + D_out_p * D_out_p)

    kernel = functools.partial(autoencoder_kernel, mxu_dtype=mxu_dtype)

    return pl.pallas_call(
        kernel,
        out_shape=jax.ShapeDtypeStruct((B, D_in), jnp.float32),
        grid_spec=pl.GridSpec(
            grid=grid,
            in_specs=[
                pl.BlockSpec((bt, D_in), lambda i: (i, 0)),          # x tile
                pl.BlockSpec((D_in, D_out_p), lambda i: (0, 0)),     # w_enc (resident)
                pl.BlockSpec((D_out_p, D_in), lambda i: (0, 0)),     # w_dec (resident)
                pl.BlockSpec((D_out_p, D_out_p), lambda i: (0, 0)),  # hw_t  (resident)
                pl.BlockSpec((1, D_out_p), lambda i: (0, 0)),        # b1
                pl.BlockSpec((1, D_in), lambda i: (0, 0)),           # b2
                pl.BlockSpec((1, D_out_p), lambda i: (0, 0)),        # hb
            ],
            out_specs=pl.BlockSpec((bt, D_in), lambda i: (i, 0)),
        ),
        compiler_params=pltpu.CompilerParams(
            dimension_semantics=("parallel",),
            vmem_limit_bytes=vmem_limit),
        cost_estimate=pl.CostEstimate(
            flops=flops,
            transcendentals=transcendentals,
            bytes_accessed=bytes_accessed),
    )(x_f32, w_enc, w_dec, hw_t, b1_p, b2_p, hb_p)


def reference_forward(x, w, b1, b2, hw, hb, mxu_dtype=jnp.float32):
    def mm(a, bmat):
        return jnp.dot(a.astype(mxu_dtype), bmat.astype(mxu_dtype),
                       preferred_element_type=jnp.float32)
    enc = jnp.maximum(mm(x, w.T) + b1, 0.0)
    h = mm(enc, hw.T) + hb
    t = jax.nn.sigmoid(h)
    hwy = jnp.maximum(h, 0.0) * t + enc * (1.0 - t)
    return jax.nn.sigmoid(mm(hwy, w) + b2)


if __name__ == "__main__":
    key = jax.random.PRNGKey(0)
    k_x, k_w, k_b1, k_b2, k_hw, k_hb = jax.random.split(key, 6)

    B = 8
    D_in = 64      # input feature size (small)
    D_out = 100    # encoded size; forced to 100 by the H(100) block in forward

    x = jax.random.normal(k_x, (B, D_in), dtype=jnp.float32)

    # autoEncodeur parameters: torch.randn init
    w = jax.random.normal(k_w, (D_out, D_in), dtype=jnp.float32)
    b1 = jax.random.normal(k_b1, (D_out,), dtype=jnp.float32)
    b2 = jax.random.normal(k_b2, (D_in,), dtype=jnp.float32)

    # Highway H(100).H linear params: nn.Linear default init U(-1/sqrt(n), 1/sqrt(n))
    bound = 1.0 / jnp.sqrt(jnp.float32(D_out))
    hw = jax.random.uniform(k_hw, (D_out, D_out), dtype=jnp.float32,
                            minval=-bound, maxval=bound)
    hb = jax.random.uniform(k_hb, (D_out,), dtype=jnp.float32,
                            minval=-bound, maxval=bound)
    # (The T linear of the highway block is unused in its forward, so omitted.)

    # 1) exact-precision path (f32 MXU operands): tight check vs. reference.
    out_f32 = jax.block_until_ready(
        auto_encodeur_forward(x, w, b1, b2, hw, hb, mxu_dtype=jnp.float32))
    ref_f32 = reference_forward(x, w, b1.reshape(1, -1), b2.reshape(1, -1),
                                hw, hb.reshape(1, -1))
    assert out_f32.shape == (B, D_in)
    assert jnp.allclose(out_f32, ref_f32, atol=1e-5, rtol=1e-5)

    # 2) default fast path (bf16 MXU operands, f32 accumulate): check vs. a
    #    matching-precision reference with a looser tolerance.
    out_bf16 = jax.block_until_ready(auto_encodeur_forward(x, w, b1, b2, hw, hb))
    ref_bf16 = reference_forward(x, w, b1.reshape(1, -1), b2.reshape(1, -1),
                                 hw, hb.reshape(1, -1), mxu_dtype=jnp.bfloat16)
    assert out_bf16.shape == (B, D_in)
    assert jnp.allclose(out_bf16, ref_bf16, atol=2e-2, rtol=2e-2)

    # 3) ragged batch (B not a multiple of the tile) exercises the masked last block.
    x_r = jax.random.normal(k_x, (10, D_in), dtype=jnp.float32)
    out_r = jax.block_until_ready(
        auto_encodeur_forward(x_r, w, b1, b2, hw, hb, mxu_dtype=jnp.float32))
    ref_r = reference_forward(x_r, w, b1.reshape(1, -1), b2.reshape(1, -1),
                              hw, hb.reshape(1, -1))
    assert out_r.shape == (10, D_in)
    assert jnp.allclose(out_r, ref_r, atol=1e-5, rtol=1e-5)

    print("KERNEL_OK")
</pallas_src>

<mosaic_0001>
module attributes {stable_mosaic.version = 11 : i64} {
  func.func @autoencoder_kernel(%arg0: i32, %arg1: memref<8x64xf32, #tpu.memory_space<vmem>>, %arg2: memref<64x128xf32, #tpu.memory_space<vmem>>, %arg3: memref<128x64xf32, #tpu.memory_space<vmem>>, %arg4: memref<128x128xf32, #tpu.memory_space<vmem>>, %arg5: memref<1x128xf32, #tpu.memory_space<vmem>>, %arg6: memref<1x64xf32, #tpu.memory_space<vmem>>, %arg7: memref<1x128xf32, #tpu.memory_space<vmem>>, %arg8: memref<8x64xf32, #tpu.memory_space<vmem>>) attributes {dimension_semantics = [#tpu.dimension_semantics<parallel>], iteration_bounds = array<i64: 1>, scalar_prefetch = 0 : i64, scratch_operands = 0 : i64, tpu.core_type = #tpu.core_type<tc>, window_params = [{transform_indices = @transform_0, window_bounds = array<i64: 8, 64>}, {pipeline_mode = #tpu.pipeline_mode<synchronous>, transform_indices = @transform_1, window_bounds = array<i64: 64, 128>}, {pipeline_mode = #tpu.pipeline_mode<synchronous>, transform_indices = @transform_2, window_bounds = array<i64: 128, 64>}, {pipeline_mode = #tpu.pipeline_mode<synchronous>, transform_indices = @transform_3, window_bounds = array<i64: 128, 128>}, {pipeline_mode = #tpu.pipeline_mode<synchronous>, transform_indices = @transform_4, window_bounds = array<i64: 1, 128>}, {pipeline_mode = #tpu.pipeline_mode<synchronous>, transform_indices = @transform_5, window_bounds = array<i64: 1, 64>}, {pipeline_mode = #tpu.pipeline_mode<synchronous>, transform_indices = @transform_6, window_bounds = array<i64: 1, 128>}, {transform_indices = @transform_7, window_bounds = array<i64: 8, 64>}]} {
    %c0 = arith.constant 0 : index
    %c0_0 = arith.constant 0 : index
    %0 = vector.load %arg1[%c0, %c0_0] : memref<8x64xf32, #tpu.memory_space<vmem>>, vector<8x64xf32>
    %c0_1 = arith.constant 0 : index
    %c0_2 = arith.constant 0 : index
    %1 = vector.load %arg2[%c0_1, %c0_2] : memref<64x128xf32, #tpu.memory_space<vmem>>, vector<64x128xf32>
    %cst = arith.constant dense<0.000000e+00> : vector<8x128xf32>
    %2 = tpu.matmul %0, %1, %cst {dimension_numbers = #tpu.dot_dimension_numbers<[1], [0], [0], [1], [0, 0, 1, 1], [], []>} : vector<8x64xf32>, vector<64x128xf32>, vector<8x128xf32> -> vector<8x128xf32>
    %c0_3 = arith.constant 0 : index
    %c0_4 = arith.constant 0 : index
    %3 = vector.load %arg5[%c0_3, %c0_4] : memref<1x128xf32, #tpu.memory_space<vmem>>, vector<1x128xf32>
    %4 = vector.broadcast %3 : vector<1x128xf32> to vector<8x128xf32>
    %5 = arith.addf %2, %4 : vector<8x128xf32>
    %cst_5 = arith.constant 0.000000e+00 : f32
    %6 = vector.broadcast %cst_5 : f32 to vector<8x128xf32>
    %7 = arith.maximumf %5, %6 : vector<8x128xf32>
    %c0_6 = arith.constant 0 : index
    %c0_7 = arith.constant 0 : index
    %8 = vector.load %arg4[%c0_6, %c0_7] : memref<128x128xf32, #tpu.memory_space<vmem>>, vector<128x128xf32>
    %cst_8 = arith.constant dense<0.000000e+00> : vector<8x128xf32>
    %9 = tpu.matmul %7, %8, %cst_8 {dimension_numbers = #tpu.dot_dimension_numbers<[1], [0], [0], [1], [0, 0, 1, 1], [], []>} : vector<8x128xf32>, vector<128x128xf32>, vector<8x128xf32> -> vector<8x128xf32>
    %c0_9 = arith.constant 0 : index
    %c0_10 = arith.constant 0 : index
    %10 = vector.load %arg7[%c0_9, %c0_10] : memref<1x128xf32, #tpu.memory_space<vmem>>, vector<1x128xf32>
    %11 = vector.broadcast %10 : vector<1x128xf32> to vector<8x128xf32>
    %12 = arith.addf %9, %11 : vector<8x128xf32>
    %cst_11 = arith.constant 5.000000e-01 : f32
    %13 = vector.broadcast %cst_11 : f32 to vector<8x128xf32>
    %14 = arith.mulf %13, %12 : vector<8x128xf32>
    %15 = math.tanh %14 : vector<8x128xf32>
    %cst_12 = arith.constant 1.000000e+00 : f32
    %16 = vector.broadcast %cst_12 : f32 to vector<8x128xf32>
    %17 = arith.addf %15, %16 : vector<8x128xf32>
    %cst_13 = arith.constant 5.000000e-01 : f32
    %18 = vector.broadcast %cst_13 : f32 to vector<8x128xf32>
    %19 = arith.mulf %18, %17 : vector<8x128xf32>
    %cst_14 = arith.constant 0.000000e+00 : f32
    %20 = vector.broadcast %cst_14 : f32 to vector<8x128xf32>
    %21 = arith.maximumf %12, %20 : vector<8x128xf32>
    %22 = arith.subf %21, %7 : vector<8x128xf32>
    %23 = arith.mulf %19, %22 : vector<8x128xf32>
    %24 = arith.addf %7, %23 : vector<8x128xf32>
    %c0_15 = arith.constant 0 : index
    %c0_16 = arith.constant 0 : index
    %25 = vector.load %arg3[%c0_15, %c0_16] : memref<128x64xf32, #tpu.memory_space<vmem>>, vector<128x64xf32>
    %cst_17 = arith.constant dense<0.000000e+00> : vector<8x64xf32>
    %26 = tpu.matmul %24, %25, %cst_17 {dimension_numbers = #tpu.dot_dimension_numbers<[1], [0], [0], [1], [0, 0, 1, 1], [], []>} : vector<8x128xf32>, vector<128x64xf32>, vector<8x64xf32> -> vector<8x64xf32>
    %c0_18 = arith.constant 0 : index
    %c0_19 = arith.constant 0 : index
    %27 = vector.load %arg6[%c0_18, %c0_19] : memref<1x64xf32, #tpu.memory_space<vmem>>, vector<1x64xf32>
    %28 = vector.broadcast %27 : vector<1x64xf32> to vector<8x64xf32>
    %29 = arith.addf %26, %28 : vector<8x64xf32>
    %cst_20 = arith.constant 5.000000e-01 : f32
    %30 = vector.broadcast %cst_20 : f32 to vector<8x64xf32>
    %31 = arith.mulf %30, %29 : vector<8x64xf32>
    %32 = math.tanh %31 : vector<8x64xf32>
    %cst_21 = arith.constant 1.000000e+00 : f32
    %33 = vector.broadcast %cst_21 : f32 to vector<8x64xf32>
    %34 = arith.addf %32, %33 : vector<8x64xf32>
    %cst_22 = arith.constant 5.000000e-01 : f32
    %35 = vector.broadcast %cst_22 : f32 to vector<8x64xf32>
    %36 = arith.mulf %35, %34 : vector<8x64xf32>
    %c0_23 = arith.constant 0 : index
    %c0_24 = arith.constant 0 : index
    %37 = vector.load %arg8[%c0_23, %c0_24] : memref<8x64xf32, #tpu.memory_space<vmem>>, vector<8x64xf32>
    tpu.vector_store %arg8[%c0_23, %c0_24], %36 {strides = array<i32>} : memref<8x64xf32, #tpu.memory_space<vmem>>, vector<8x64xf32>,
    return
  }
  func.func @transform_0(%arg0: i32) -> (i32, i32) {
    %c0_i32 = arith.constant 0 : i32
    %c0_i32_0 = arith.constant 0 : i32
    return %arg0, %c0_i32 : i32, i32
  }
  func.func @transform_1(%arg0: i32) -> (i32, i32) {
    %c0_i32 = arith.constant 0 : i32
    %c0_i32_0 = arith.constant 0 : i32
    %c0_i32_1 = arith.constant 0 : i32
    return %c0_i32, %c0_i32_0 : i32, i32
  }
  func.func @transform_2(%arg0: i32) -> (i32, i32) {
    %c0_i32 = arith.constant 0 : i32
    %c0_i32_0 = arith.constant 0 : i32
    %c0_i32_1 = arith.constant 0 : i32
    return %c0_i32, %c0_i32_0 : i32, i32
  }
  func.func @transform_3(%arg0: i32) -> (i32, i32) {
    %c0_i32 = arith.constant 0 : i32
    %c0_i32_0 = arith.constant 0 : i32
    %c0_i32_1 = arith.constant 0 : i32
    return %c0_i32, %c0_i32_0 : i32, i32
  }
  func.func @transform_4(%arg0: i32) -> (i32, i32) {
    %c0_i32 = arith.constant 0 : i32
    %c0_i32_0 = arith.constant 0 : i32
    %c0_i32_1 = arith.constant 0 : i32
    return %c0_i32, %c0_i32_0 : i32, i32
  }
  func.func @transform_5(%arg0: i32) -> (i32, i32) {
    %c0_i32 = arith.constant 0 : i32
    %c0_i32_0 = arith.constant 0 : i32
    %c0_i32_1 = arith.constant 0 : i32
    return %c0_i32, %c0_i32_0 : i32, i32
  }
  func.func @transform_6(%arg0: i32) -> (i32, i32) {
    %c0_i32 = arith.constant 0 : i32
    %c0_i32_0 = arith.constant 0 : i32
    %c0_i32_1 = arith.constant 0 : i32
    return %c0_i32, %c0_i32_0 : i32, i32
  }
  func.func @transform_7(%arg0: i32) -> (i32, i32) {
    %c0_i32 = arith.constant 0 : i32
    %c0_i32_0 = arith.constant 0 : i32
    return %arg0, %c0_i32 : i32, i32
  }
}

</mosaic_0001>

<bundles_post_ra>
// kernel: tpu_custom_call.1
= control target key start
LH: loop header
LB: loop body
LE: loop exit
PB: predicated region body
PF: predicated region fallthrough
CT: control target
= control target key end

     0   :  { %v559_v3 = vmov 0.0|0.0   ;;  %vm560_vm0 = vmmov 0   ;;  %v561_v6 = vmov 0.0   ;;  %s772_s0 = inlined_call_operand.vmem [shape: f32[8,64], index: 0, kind: input, shape index: {}]   ;;  %s773_s1 = inlined_call_operand.vmem [shape: f32[64,128], index: 1, kind: input, shape index: {}]   ;;  %s774_s2 = inlined_call_operand.vmem [shape: f32[128,64], index: 2, kind: input, shape index: {}]   ;;  %s775_s3 = inlined_call_operand.vmem [shape: f32[128,128], index: 3, kind: input, shape index: {}]   ;;  %s776_s4 = inlined_call_operand.vmem [shape: f32[1,128], index: 4, kind: input, shape index: {}]   ;;  %s777_s5 = inlined_call_operand.vmem [shape: f32[1,64], index: 5, kind: input, shape index: {}]   ;;  %s778_s6 = inlined_call_operand.vmem [shape: f32[1,128], index: 6, kind: input, shape index: {}]   ;;  %s779_s7 = inlined_call_operand.hbm [shape: f32[8,64], index: 7, kind: output, shape index: {}]  }
   0x1   :  { %v28_v0 = vld [vmem:[%s773_s1] sm:$0xff]  ;;  %v29_v1 = vld [vmem:[%s773_s1 + $0x8] sm:$0xff]  ;;  %v30_v2 = vld [vmem:[%s773_s1 + $0x10] sm:$0xff]  ;;  %467 = vmatprep.subr.bf16.mxu0 %v559_v3  ;;  %394 = vmatprep.mubr.msk.f32.mxu0 %vm560_vm0, %v561_v6 }
   0x2   :  { %v468_v4 = vpack.c.bf16 %v29_v1, %v28_v0  ;;  %v31_v5 = vld [vmem:[%s773_s1 + $0x18] sm:$0xff]  ;;  %479 = vmatprep.subr.bf16.mxu1 %v559_v3  ;;  %429 = vmatprep.mubr.msk.f32.mxu1 %vm560_vm0, %v561_v6  ;;  %v118_v8 = vld [vmem:[%s775_s3] sm:$0xff]  ;;  %v119_v9 = vld [vmem:[%s775_s3 + $0x8] sm:$0xff] }
   0x3   :  { %v471_v7 = vpack.c.bf16 %v31_v5, %v30_v2  ;;  %v120_v10 = vld [vmem:[%s775_s3 + $0x10] sm:$0xff]  ;;  %v32_v11 = vld [vmem:[%s773_s1 + $0x20] sm:$0xff]  ;;  %v33_v12 = vld [vmem:[%s773_s1 + $0x28] sm:$0xff]  ;;  %v480_v13 = vpack.c.bf16 %v119_v9, %v118_v8 }
   0x4   :  { %469 = vmatpush3.bf16.msra.mxu0 %v468_v4  ;;  %v121_v14 = vld [vmem:[%s775_s3 + $0x18] sm:$0xff]  ;;  %v474_v16 = vpack.c.bf16 %v33_v12, %v32_v11  ;;  %v122_v17 = vld [vmem:[%s775_s3 + $0x20] sm:$0xff]  ;;  %v123_v18 = vld [vmem:[%s775_s3 + $0x28] sm:$0xff] }
   0x5   :  { %470 = vmatprep.subr.bf16.mxu0 %v559_v3  ;;  %481 = vmatpush3.bf16.msra.mxu1 %v480_v13  ;;  %v483_v15 = vpack.c.bf16 %v121_v14, %v120_v10  ;;  %v34_v19 = vld [vmem:[%s773_s1 + $0x30] sm:$0xff]  ;;  %v35_v20 = vld [vmem:[%s773_s1 + $0x38] sm:$0xff] }
   0x6   :  { %482 = vmatprep.subr.bf16.mxu1 %v559_v3 }
   0x8   :  { %472 = vmatpush3.bf16.msra.mxu0 %v471_v7 }
   0x9   :  { %473 = vmatprep.subr.bf16.mxu0 %v559_v3 }
   0xa   :  { %12 = vsyncpa [#allocation3], 0  ;;  %484 = vmatpush3.bf16.msra.mxu1 %v483_v15  ;;  %v486_v21 = vpack.c.bf16 %v123_v18, %v122_v17  ;;  %v477_v22 = vpack.c.bf16 %v35_v20, %v34_v19  ;;  %v124_v23 = vld [vmem:[%s775_s3 + $0x30] sm:$0xff]  ;;  %v125_v24 = vld [vmem:[%s775_s3 + $0x38] sm:$0xff]  ;;  %vm43_vm1 = vcmask 523264  }
   0xb   :  { %485 = vmatprep.subr.bf16.mxu1 %v559_v3  ;;  %v489_v25 = vpack.c.bf16 %v125_v24, %v124_v23  ;;  %v27_v26 = vld [vmem:[%s772_s0] sm:$0xff]  ;;  %v127_v28 = vld [vmem:[%s775_s3 + $0x48] sm:$0xff]  ;;  %v128_v30 = vld [vmem:[%s775_s3 + $0x50] sm:$0xff] }
   0xc   :  { %475 = vmatpush3.bf16.msra.mxu0 %v474_v16  ;;  %v126_v27 = vld [vmem:[%s775_s3 + $0x40] sm:$0xff]  ;;  %v129_v31 = vld [vmem:[%s775_s3 + $0x58] sm:$0xff]  ;;  %v131_v34 = vld [vmem:[%s775_s3 + $0x68] sm:$0xff] }
   0xd   :  { %476 = vmatprep.subr.bf16.mxu0 %v559_v3  ;;  %v492_v29 = vpack.c.bf16 %v127_v28, %v126_v27  ;;  %v495_v32 = vpack.c.bf16 %v129_v31, %v128_v30  ;;  %v130_v33 = vld [vmem:[%s775_s3 + $0x60] sm:$0xff]  ;;  %v132_v36 = vld [vmem:[%s775_s3 + $0x70] sm:$0xff]  ;;  %v133_v37 = vld [vmem:[%s775_s3 + $0x78] sm:$0xff] }
   0xe   :  { %487 = vmatpush3.bf16.msra.mxu1 %v486_v21  ;;  %v498_v35 = vpack.c.bf16 %v131_v34, %v130_v33  ;;  %v501_v38 = vpack.c.bf16 %v133_v37, %v132_v36  ;;  %v219_v39 = vld [vmem:[%s774_s2] sm:$0xff]  ;;  %v220_v40 = vld [vmem:[%s774_s2 + $0x8] sm:$0xff]  ;;  %v221_v41 = vld [vmem:[%s774_s2 + $0x10] sm:$0xff] }
   0xf   :  { %488 = vmatprep.subr.bf16.mxu1 %v559_v3  ;;  %v504_v42 = vpack.c.bf16 %v220_v40, %v219_v39  ;;  %v222_v43 = vld [vmem:[%s774_s2 + $0x18] sm:$0xff]  ;;  %v331_v45 = vld [vmem:[%s776_s4] ss:$0 sm:$0xff]  ;;  %v224_v51 = vld [vmem:[%s774_s2 + $0x28] sm:$0xff] }
  0x10   :  { %478 = vmatpush3.bf16.msra.mxu0 %v477_v22  ;;  %v507_v44 = vpack.c.bf16 %v222_v43, %v221_v41  ;;  %v223_v50 = vld [vmem:[%s774_s2 + $0x20] sm:$0xff]  ;;  %v225_v53 = vld [vmem:[%s774_s2 + $0x30] sm:$0xff]  ;;  %v226_v54 = vld [vmem:[%s774_s2 + $0x38] sm:$0xff] }
  0x11   :  { %503 = vmatprep.subr.bf16.mxu0 %v559_v3  ;;  %v510_v52 = vpack.c.bf16 %v224_v51, %v223_v50  ;;  %v513_v55 = vpack.c.bf16 %v226_v54, %v225_v53  ;;  %v227_v56 = vld [vmem:[%s774_s2 + $0x40] sm:$0xff]  ;;  %v228_v57 = vld [vmem:[%s774_s2 + $0x48] sm:$0xff]  ;;  %v229_v59 = vld [vmem:[%s774_s2 + $0x50] sm:$0xff] }
  0x12   :  { %490 = vmatpush3.bf16.msra.mxu1 %v489_v25  ;;  %v516_v58 = vpack.c.bf16 %v228_v57, %v227_v56  ;;  %v230_v60 = vld [vmem:[%s774_s2 + $0x58] sm:$0xff]  ;;  %v231_v62 = vld [vmem:[%s774_s2 + $0x60] sm:$0xff]  ;;  %v232_v63 = vld [vmem:[%s774_s2 + $0x68] sm:$0xff] }
  0x13   :  { %395 = vmatmul.mubr.msk.f32.vlgmr.msra.gmra.mrb[0].mxu0 %vm43_vm1, %v27_v26  ;;  %491 = vmatprep.subr.bf16.mxu1 %v559_v3  ;;  %v519_v61 = vpack.c.bf16 %v230_v60, %v229_v59  ;;  %v522_v0 = vpack.c.bf16 %v232_v63, %v231_v62  ;;  %v233_v1 = vld [vmem:[%s774_s2 + $0x70] sm:$0xff]  ;;  %v234_v2 = vld [vmem:[%s774_s2 + $0x78] sm:$0xff]  ;;  %v333_v5 = vld [vmem:[%s778_s6] ss:$0 sm:$0xff]  ;;  %s562_s6 = smov [#allocation2]  }
  0x14   :  { %464 = vmatprep.mubr.msk.f32.mxu0 %vm560_vm0, %v561_v6  ;;  %505 = vmatpush3.bf16.msra.mxu0 %v504_v42  ;;  %v525_v4 = vpack.c.bf16 %v234_v2, %v233_v1  ;;  %v334_v16 = vld [vmem:[%s777_s5] ss:$0 sm:$0xff]  ;;  %s323_s11 = sshll.u32 %s562_s6, 4  ;;  %s324_s11 = int_to_ptr.vmem [resolvable:$true] %s323_s11 }
  0x15   :  { %506 = vmatprep.subr.bf16.mxu0 %v559_v3  ;;  %s535_s12 = scalar_lea.vmem %s324_s11, 128  ;;  %p540_p1 = scmp.lt.s32.totalorder %s324_s11, %s324_s11 }
  0x16   :  { %493 = vmatpush3.bf16.msra.mxu1 %v492_v29  ;;  %p536_p0 = scmp.ne.s32.totalorder %s324_s11, %s535_s12  ;;  %p541_p2 = scmp.lt.s32.totalorder %s535_s12, %s535_s12 }
  0x17   :  { %494 = vmatprep.subr.bf16.mxu1 %v559_v3 }
  0x18   :  { %508 = vmatpush3.bf16.msra.mxu0 %v507_v44  ;;  %p542_p3 = por %p541_p2, %p540_p1 }
  0x19   :  { %509 = vmatprep.subr.bf16.mxu0 %v559_v3 }
  0x1a   :  { %496 = vmatpush3.bf16.msra.mxu1 %v495_v32  ;;  %p543_p4 = pnand %p542_p3, %p536_p0 }
  0x1b   :  { %497 = vmatprep.subr.bf16.mxu1 %v559_v3 }
  0x1c   :  { %511 = vmatpush3.bf16.msra.mxu0 %v510_v52 }
  0x1d   :  { %512 = vmatprep.subr.bf16.mxu0 %v559_v3 }
  0x1e   :  { %499 = vmatpush3.bf16.msra.mxu1 %v498_v35 }
  0x1f   :  { %500 = vmatprep.subr.bf16.mxu1 %v559_v3 }
  0x20   :  { %514 = vmatpush3.bf16.msra.mxu0 %v513_v55 }
  0x21   :  { %515 = vmatprep.subr.bf16.mxu0 %v559_v3 }
  0x22   :  { %502 = vmatpush3.bf16.msra.mxu1 %v501_v38 }
  0x24   :  { %517 = vmatpush3.bf16.msra.mxu0 %v516_v58 }
  0x25   :  { %518 = vmatprep.subr.bf16.mxu0 %v559_v3 }
  0x28   :  { %520 = vmatpush3.bf16.msra.mxu0 %v519_v61 }
  0x29   :  { %521 = vmatprep.subr.bf16.mxu0 %v559_v3 }
  0x2c   :  { %523 = vmatpush3.bf16.msra.mxu0 %v522_v0 }
  0x2d   :  { %524 = vmatprep.subr.bf16.mxu0 %v559_v3 }
  0x30   :  { %526 = vmatpush3.bf16.msra.mxu0 %v525_v4 }
  0xe6   :  { %v113_v46 = vpop.f32.mrb[0].mxu0 }
  0xe7   :  { %v114_v47 = vadd.f32 %v331_v45, %v113_v46  ;;  %v396_v48 = vpop.f32.mrb[1].mxu0 }
  0xe9   :  { %v117_v49 = vmax.f32 %v114_v47, 0.0 }
  0xeb   :  { %430 = vmatmul.mubr.f32.vlgmr.msra.gmra.mrb[0].mxu1 %v117_v49 }
 0x1be   :  { %v207_v6 = vpop.f32.mrb[0].mxu1 }
 0x1bf   :  { %v208_v7 = vadd.f32 %v333_v5, %v207_v6  ;;  %v431_v8 = vpop.f32.mrb[1].mxu1 }
 0x1c1   :  { %v211_v9 = vmul.f32 0.5, %v208_v7  ;;  %v215_v3 = vmax.f32 %v208_v7, 0.0 }
 0x1c3   :  { %531 = vtanh.f32 %v211_v9  ;;  %v216_v13 = vsub.f32 %v215_v3, %v117_v49 }
 0x1cd   :  { %v532_v10 = vpop.eup %531 }
 0x1ce   :  { %v213_v11 = vadd.f32 1.0, %v532_v10 }
 0x1d0   :  { %v214_v12 = vmul.f32 0.5, %v213_v11 }
 0x1d2   :  { %v217_v14 = vmul.f32 %v216_v13, %v214_v12 }
 0x1d4   :  { %v218_v15 = vadd.f32 %v217_v14, %v117_v49 }
 0x1d6   :  { %465 = vmatmul.mubr.f32.vlgmr.msra.gmra.mrb[2].mxu0 %v218_v15 }
 0x2a9   :  { %v308_v17 = vpop.f32.mrb[2].mxu0 }
 0x2aa   :  { %v309_v18 = vadd.f32 %v334_v16, %v308_v17  ;;  %v466_v19 = vpop.f32.mrb[3].mxu0 }
 0x2ac   :  { %v312_v20 = vmul.f32 0.5, %v309_v18 }
 0x2ae   :  { %533 = vtanh.f32 %v312_v20 }
 0x2b8   :  { %v534_v21 = vpop.eup %533 }
 0x2b9   :  { %v314_v22 = vadd.f32 1.0, %v534_v21 }
 0x2bb   :  { %v315_v23 = vmul.f32 0.5, %v314_v22 }
 0x2bd   :  { %316 = vst.msk [vmem:[#allocation2] sm:$0xff] %vm43_vm1, %v315_v23 }
 0x2be   :  { %546 = shalt.err (!%p543_p4)
}
 0x2bf   :  { %s547_s14 = scalar_lea.hbm %s779_s7, 128 }
 0x2c0   :  { %p548_p5 = scmp.ne.s32.totalorder %s779_s7, %s547_s14  ;;  %p551_p6 = scmp.lt.u32.totalorder %s547_s14, %s779_s7 }
 0x2c2   :  { %p553_p7 = pnand %p551_p6, %p548_p5 }
 0x2c4   :  { %556 = shalt.err (!%p553_p7)
}
 0x2c5   :  { %326 = dma.vmem_to_hbm [thread:$0]  %s324_s11, 128, %s779_s7, [#allocation3]  }
 0x2c6   :  { %557 = dma.done.wait [#allocation3], 128  }
 0x2c7   :  { %558 = vsyncadd [#allocation3], 4294967168 }
 0x2c8   :  { %330 = vsyncpa [#allocation3], 1 }

</bundles_post_ra>
